<compile_context>
chip_gen: v5e
topology: v5e:2x2
jax: 0.10.0
libtpu: 0.0.40
codegen_flags: <defaults>
</compile_context>

<pallas_src>
import functools
import math

import jax
import jax.numpy as jnp
from jax.experimental import pallas as pl
from jax.experimental.pallas import tpu as pltpu


def _rms_norm_kernel(x_ref, scale_ref, o_ref, *, eps, inv_h, seg):
    """One (TILE_R, W) tile of RMSNorm.

    seg == W : the whole lane axis is one feature vector (cheap XLU lane reduce).
    seg <  W : W // seg feature rows are packed along the lane axis; the
               per-segment sum-of-squares (broadcast back to every lane of its
               segment) is a block-diagonal (W, W) matmul on the idle MXU.
    """
    x = x_ref[...].astype(jnp.float32)
    xx = x * x
    w = x_ref.shape[-1]
    if seg == w:
        ssq = jnp.sum(xx, axis=-1, keepdims=True)                      # XLU reduce
    else:
        row_seg = jax.lax.broadcasted_iota(jnp.int32, (w, w), 0) // seg
        col_seg = jax.lax.broadcasted_iota(jnp.int32, (w, w), 1) // seg
        seg_mat = (row_seg == col_seg).astype(jnp.float32)             # block-diagonal ones
        ssq = jnp.dot(xx, seg_mat, preferred_element_type=jnp.float32,
                      precision=jax.lax.Precision.HIGHEST)             # MXU segment-sum
    inv = jax.lax.rsqrt(ssq * inv_h + eps)                             # EUP
    o_ref[...] = (x * inv * scale_ref[...]).astype(o_ref.dtype)


def _round_up(a: int, b: int) -> int:
    return ((a + b - 1) // b) * b


def rms_norm(x: jnp.ndarray, scale: jnp.ndarray, *, eps: float = 1e-5,
             max_tile_rows: int | None = None) -> jnp.ndarray:
    """RMSNorm over the last axis of `x` with per-feature `scale`."""
    orig_shape = x.shape
    H = orig_shape[-1]
    R = int(math.prod(orig_shape[:-1])) if len(orig_shape) > 1 else 1

    # Lane-dense packing for small hidden sizes: fold g = 128 // H rows into one
    # 128-lane row when shapes allow (a free, contiguous reshape).
    g = 1
    if H < 128 and 128 % H == 0 and R % (128 // H) == 0:
        g = 128 // H
    W = g * H
    Rw = R // g

    x2 = x.reshape(Rw, W)                                   # contiguous reshape: free
    scale_f32 = scale.reshape(-1).astype(jnp.float32)
    scale2 = (jnp.tile(scale_f32, (g,)) if g > 1 else scale_f32).reshape(1, W)

    itemsize = jnp.dtype(x.dtype).itemsize
    sublane = max(8, 32 // itemsize)                        # f32: 8, bf16: 16, int8: 32
    bytes_per_row = itemsize * W

    # ~2 MiB input tile (=> ~8 MiB for 2x in + 2x out pipelined buffers), ~512 KiB
    # floor, and a preference for >= ~8 grid steps so the "parallel" row axis
    # shards across v7x's two TensorCores.
    target_rows = max(sublane, ((2 * 1024 * 1024) // bytes_per_row) // sublane * sublane)
    floor_rows = max(sublane, ((512 * 1024) // bytes_per_row) // sublane * sublane)
    step_rows = _round_up(-(-Rw // 8), sublane)
    tr = min(target_rows, max(step_rows, floor_rows))
    if max_tile_rows is not None:
        tr = min(tr, max(sublane, (max_tile_rows // sublane) * sublane))
    if tr >= Rw:
        tr = Rw                                             # single full-extent block
    tr = max(tr, 1)

    grid = (pl.cdiv(Rw, tr),)                               # partial last block: Pallas-masked

    out = pl.pallas_call(
        functools.partial(_rms_norm_kernel, eps=eps, inv_h=1.0 / H, seg=H),
        out_shape=jax.ShapeDtypeStruct((Rw, W), x.dtype),
        grid=grid,
        in_specs=[
            pl.BlockSpec((tr, W), lambda i: (i, 0)),        # x row tile
            pl.BlockSpec((1, W), lambda i: (0, 0)),         # scale (tiny, VMEM-resident)
        ],
        out_specs=pl.BlockSpec((tr, W), lambda i: (i, 0)),
        compiler_params=pltpu.CompilerParams(
            dimension_semantics=("parallel",),              # independent row tiles
            vmem_limit_bytes=32 * 1024 * 1024,
        ),
    )(x2, scale2)

    return out.reshape(orig_shape)


class RMSNorm:
    """JAX/Pallas port of the PyTorch RMSNorm module (normalizes the last axis)."""

    def __init__(self, size: int, dim: int = -1, eps: float = 1e-5):
        # TODO(synk): only dim=-1 (the module default / lag-llama usage) is supported.
        self.size = size
        self.dim = dim
        self.eps = eps
        self.scale = jnp.ones((size,), jnp.float32)

    def __call__(self, x: jnp.ndarray) -> jnp.ndarray:
        assert self.dim in (-1, x.ndim - 1), "only last-axis RMSNorm supported"
        assert x.shape[-1] == self.size
        return rms_norm(x, self.scale, eps=self.eps)


def _rms_norm_ref(x, scale, eps=1e-5):
    xf = x.astype(jnp.float32)
    norm = jnp.mean(xf * xf, axis=-1, keepdims=True)
    return (scale.astype(jnp.float32) * (xf * jax.lax.rsqrt(norm + eps))).astype(x.dtype)


if __name__ == "__main__":
    key = jax.random.PRNGKey(0)
    ks = jax.random.split(key, 8)

    # 1) f32, lane-dense hidden (H = 128).
    x1 = jax.random.normal(ks[0], (2, 8, 128), dtype=jnp.float32)
    s1 = jax.random.normal(ks[1], (128,), dtype=jnp.float32)
    m1 = RMSNorm(128); m1.scale = s1
    y1 = jax.block_until_ready(m1(x1))
    assert y1.shape == x1.shape and y1.dtype == x1.dtype
    assert jnp.allclose(y1, _rms_norm_ref(x1, s1), atol=1e-5, rtol=1e-5)

    # 2) bf16, small hidden (H = 32), rows divisible by 128//H -> packed lane-dense path.
    x2 = jax.random.normal(ks[2], (2, 32, 32), dtype=jnp.bfloat16)
    s2 = jax.random.normal(ks[3], (32,), dtype=jnp.float32)
    m2 = RMSNorm(32); m2.scale = s2
    y2 = jax.block_until_ready(m2(x2))
    assert y2.shape == x2.shape and y2.dtype == jnp.bfloat16
    assert jnp.allclose(y2.astype(jnp.float32), _rms_norm_ref(x2, s2).astype(jnp.float32),
                        atol=2e-2, rtol=2e-2)

    # 3) bf16, small hidden, odd row count (15) -> generic fallback path.
    x3 = jax.random.normal(ks[4], (3, 5, 32), dtype=jnp.bfloat16)
    s3 = jax.random.normal(ks[5], (32,), dtype=jnp.float32)
    m3 = RMSNorm(32); m3.scale = s3
    y3 = jax.block_until_ready(m3(x3))
    assert jnp.allclose(y3.astype(jnp.float32), _rms_norm_ref(x3, s3).astype(jnp.float32),
                        atol=2e-2, rtol=2e-2)

    # 4) f32, forced small row tile -> multi-step grid with a partial last block
    #    (exercises the Pallas-masked boundary path that replaced jnp.pad/slice).
    x4 = jax.random.normal(ks[6], (3, 5, 128), dtype=jnp.float32)
    s4 = jax.random.normal(ks[7], (128,), dtype=jnp.float32)
    y4 = jax.block_until_ready(rms_norm(x4, s4, max_tile_rows=8))
    assert jnp.allclose(y4, _rms_norm_ref(x4, s4), atol=1e-5, rtol=1e-5)

    print("KERNEL_OK")
</pallas_src>

<mosaic_0001>
module attributes {stable_mosaic.version = 11 : i64} {
  func.func @_rms_norm_kernel(%arg0: i32, %arg1: memref<16x128xf32, #tpu.memory_space<vmem>>, %arg2: memref<1x128xf32, #tpu.memory_space<vmem>>, %arg3: memref<16x128xf32, #tpu.memory_space<vmem>>) attributes {dimension_semantics = [#tpu.dimension_semantics<parallel>], iteration_bounds = array<i64: 1>, scalar_prefetch = 0 : i64, scratch_operands = 0 : i64, tpu.core_type = #tpu.core_type<tc>, window_params = [{transform_indices = @transform_0, window_bounds = array<i64: 16, 128>}, {pipeline_mode = #tpu.pipeline_mode<synchronous>, transform_indices = @transform_1, window_bounds = array<i64: 1, 128>}, {transform_indices = @transform_2, window_bounds = array<i64: 16, 128>}]} {
    %c0 = arith.constant 0 : index
    %c0_0 = arith.constant 0 : index
    %0 = vector.load %arg1[%c0, %c0_0] : memref<16x128xf32, #tpu.memory_space<vmem>>, vector<16x128xf32>
    %1 = arith.mulf %0, %0 : vector<16x128xf32>
    %cst = arith.constant dense<0.000000e+00> : vector<16xf32>
    %2 = vector.multi_reduction <add>, %1, %cst [1] : vector<16x128xf32> to vector<16xf32>
    %3 = vector.shape_cast %2 : vector<16xf32> to vector<16x1xf32>
    %cst_1 = arith.constant 7.812500e-03 : f32
    %4 = vector.broadcast %cst_1 : f32 to vector<16x1xf32>
    %5 = arith.mulf %3, %4 : vector<16x1xf32>
    %cst_2 = arith.constant 9.99999974E-6 : f32
    %6 = vector.broadcast %cst_2 : f32 to vector<16x1xf32>
    %7 = arith.addf %5, %6 : vector<16x1xf32>
    %8 = math.rsqrt %7 : vector<16x1xf32>
    %9 = vector.broadcast %8 : vector<16x1xf32> to vector<16x128xf32>
    %10 = arith.mulf %0, %9 : vector<16x128xf32>
    %c0_3 = arith.constant 0 : index
    %c0_4 = arith.constant 0 : index
    %11 = vector.load %arg2[%c0_3, %c0_4] : memref<1x128xf32, #tpu.memory_space<vmem>>, vector<1x128xf32>
    %12 = vector.broadcast %11 : vector<1x128xf32> to vector<16x128xf32>
    %13 = arith.mulf %10, %12 : vector<16x128xf32>
    %c0_5 = arith.constant 0 : index
    %c0_6 = arith.constant 0 : index
    %14 = vector.load %arg3[%c0_5, %c0_6] : memref<16x128xf32, #tpu.memory_space<vmem>>, vector<16x128xf32>
    tpu.vector_store %arg3[%c0_5, %c0_6], %13 {strides = array<i32>} : memref<16x128xf32, #tpu.memory_space<vmem>>, vector<16x128xf32>,
    return
  }
  func.func @transform_0(%arg0: i32) -> (i32, i32) {
    %c0_i32 = arith.constant 0 : i32
    %c0_i32_0 = arith.constant 0 : i32
    return %arg0, %c0_i32 : i32, i32
  }
  func.func @transform_1(%arg0: i32) -> (i32, i32) {
    %c0_i32 = arith.constant 0 : i32
    %c0_i32_0 = arith.constant 0 : i32
    %c0_i32_1 = arith.constant 0 : i32
    return %c0_i32, %c0_i32_0 : i32, i32
  }
  func.func @transform_2(%arg0: i32) -> (i32, i32) {
    %c0_i32 = arith.constant 0 : i32
    %c0_i32_0 = arith.constant 0 : i32
    return %arg0, %c0_i32 : i32, i32
  }
}

</mosaic_0001>

<bundles_post_ra>
// kernel: tpu_custom_call.1
= control target key start
LH: loop header
LB: loop body
LE: loop exit
PB: predicated region body
PF: predicated region fallthrough
CT: control target
= control target key end

     0   :  { %7 = vsyncpa [#allocation3], 0  ;;  %s227_s0 = inlined_call_operand.hbm [shape: f32[16,128], index: 0, kind: input, shape index: {}]   ;;  %s228_s1 = inlined_call_operand.hbm [shape: f32[1,128], index: 1, kind: input, shape index: {}]   ;;  %s229_s2 = inlined_call_operand.hbm [shape: f32[16,128], index: 2, kind: output, shape index: {}]  }
   0x1   :  { %8 = vsyncpa [#allocation6], 0 }
   0x2   :  { %9 = vsyncpa [#allocation4], 0  ;;  %s14_s11 = sshll.u32 %s227_s0, 4  ;;  %s192_s12 = smov [#allocation2]   ;;  %s15_s11 = int_to_ptr.hbm [resolvable:$true] %s14_s11 }
   0x3   :  { %s16_s13 = sshll.u32 %s192_s12, 4  ;;  %s28_s16 = sshll.u32 %s228_s1, 4  ;;  %s17_s13 = int_to_ptr.vmem [resolvable:$true] %s16_s13  ;;  %s29_s16 = int_to_ptr.hbm [resolvable:$true] %s28_s16 }
   0x4   :  { %s193_s17 = smov 128   ;;  %s194_s18 = smov 8  }
   0x5   :  { %22 = dma.hbm_to_vmem [thread:$0]  %s15_s11, 256, %s17_s13, [#allocation3], %s193_s17, %s193_s17, %s194_s18  }
   0x6   :  { %s195_s19 = smov [#allocation5]  }
   0x7   :  { %s30_s20 = sshll.u32 %s195_s19, 4  ;;  %s31_s20 = int_to_ptr.vmem [resolvable:$true] %s30_s20 }
   0x8   :  { %33 = dma.hbm_to_vmem [thread:$0]  %s29_s16, 16, %s31_s20, [#allocation6]  }
   0x9   :  { %186 = dma.done.wait [#allocation3], 256  }
   0xa   :  { %187 = vsyncadd [#allocation3], 4294967040 }
   0xb   :  { %188 = dma.done.wait [#allocation6], 16  }
   0xc   :  { %189 = vsyncadd [#allocation6], 4294967280  ;;  %v42_v0 = vld [vmem:[#allocation2] sm:$0xff]  ;;  %v43_v2 = vld [vmem:[#allocation2 + $0x8] sm:$0xff]  ;;  %s196_s0 = smov [#allocation7]   ;;  %s90_s23 = sshll.u32 %s229_s2, 4  ;;  %s91_s23 = int_to_ptr.hbm [resolvable:$true] %s90_s23 }
   0xd   :  { %v44_v1 = vmul.f32 %v42_v0, %v42_v0  ;;  %v45_v3 = vmul.f32 %v43_v2, %v43_v2  ;;  %v109_v18 = vld [vmem:[#allocation5] ss:$0 sm:$0xff]  ;;  %s88_s1 = sshll.u32 %s196_s0, 4  ;;  %s89_s1 = int_to_ptr.vmem [resolvable:$true] %s88_s1 }
   0xf   :  { %46 = vadd.xlane.f32.xlu0 %v44_v1 }
  0x17   :  { %48 = vadd.xlane.f32.xlu0 %v45_v3 }
  0x82   :  { %v47_v4 = vpop.xlane.xlu0 %46 }
  0x83   :  { %v50_v5 = vmul.f32 0.0078125, %v47_v4 }
  0x85   :  { %v52_v6 = vadd.f32 1e-05, %v50_v5 }
  0x87   :  { %110 = vrsqrt.f32 %v52_v6  ;;  %vm60_vm1 = vweird.f32 %v52_v6 }
  0x8a   :  { %v49_v7 = vpop.xlane.xlu0 %48 }
  0x8b   :  { %v51_v8 = vmul.f32 0.0078125, %v49_v7 }
  0x8d   :  { %v111_v9 = vpop.eup %110  ;;  %v53_v10 = vadd.f32 1e-05, %v51_v8 }
  0x8e   :  { %v55_v11 = vmul.f32 %v111_v9, %v52_v6  ;;  %vm61_vm0 = vweird.f32 %v111_v9 }
  0x8f   :  { %112 = vrsqrt.f32 %v53_v10  ;;  %vm62_vm2 = vmor %vm60_vm1, %vm61_vm0  ;;  %vm70_vm4 = vweird.f32 %v53_v10 }
  0x90   :  { %v56_v12 = vmul.f32 %v111_v9, %v55_v11 }
  0x92   :  { %v57_v13 = vmul.f32 0.5, %v56_v12 }
  0x94   :  { %v58_v14 = vsub.f32 1.5, %v57_v13 }
  0x95   :  { %v113_v15 = vpop.eup %112 }
  0x96   :  { %v59_v16 = vmul.f32 %v111_v9, %v58_v14  ;;  %v65_v17 = vmul.f32 %v113_v15, %v53_v10  ;;  %vm71_vm3 = vweird.f32 %v113_v15 }
  0x97   :  { %vm72_vm5 = vmor %vm70_vm4, %vm71_vm3 }
  0x98   :  { %v63_v19 = vsel %vm62_vm2, %v111_v9, %v59_v16  ;;  %v66_v20 = vmul.f32 %v113_v15, %v65_v17 }
  0x99   :  { %v74_v21 = vmul.f32 %v63_v19, %v42_v0 }
  0x9a   :  { %v67_v22 = vmul.f32 0.5, %v66_v20 }
  0x9b   :  { %v80_v23 = vmul.f32 %v109_v18, %v74_v21 }
  0x9c   :  { %v68_v24 = vsub.f32 1.5, %v67_v22 }
  0x9d   :  { %82 = vst [vmem:[#allocation7] sm:$0xff] %v80_v23 }
  0x9e   :  { %v69_v25 = vmul.f32 %v113_v15, %v68_v24 }
  0xa0   :  { %v73_v26 = vsel %vm72_vm5, %v113_v15, %v69_v25 }
  0xa1   :  { %v75_v27 = vmul.f32 %v73_v26, %v43_v2 }
  0xa3   :  { %v81_v28 = vmul.f32 %v109_v18, %v75_v27 }
  0xa5   :  { %83 = vst [vmem:[#allocation7 + $0x8] sm:$0xff] %v81_v28 }
  0xa6   :  { %96 = dma.vmem_to_hbm [thread:$0]  %s89_s1, 256, %s91_s23, [#allocation4], %s193_s17, %s193_s17, %s194_s18  }
  0xa7   :  { %190 = dma.done.wait [#allocation4], 256  }
  0xa8   :  { %191 = vsyncadd [#allocation4], 4294967040 }
  0xa9   :  { %101 = vsyncpa [#allocation3], 1 }
  0xaa   :  { %102 = vsyncpa [#allocation6], 1 }
  0xab   :  { %103 = vsyncpa [#allocation4], 1 }

</bundles_post_ra>
